<compile_context>
chip_gen: v7x
topology: tpu7x:2x2x1
jax: 0.10.0
libtpu: 0.0.40
codegen_flags: <defaults>
</compile_context>

<pallas_src>
import jax
import jax.numpy as jnp
from jax.experimental import pallas as pl
from jax.experimental.pallas import tpu as pltpu


def _make_muladd_kernel(a, b):
    """Build an elementwise x*a+b kernel with a, b baked in as immediates."""
    a = float(a)
    b = float(b)

    def kernel(x_ref, o_ref):
        o_ref[...] = x_ref[...] * a + b

    return kernel


def _aligned_tile(dim, max_tile, align):
    """Full dim if it fits; otherwise the largest multiple of `align` <= max_tile."""
    if dim <= max_tile:
        return dim
    return max(align, (max_tile // align) * align)


def torch_module_forward(x, a, b, *,
                         max_tile_m=512,
                         max_tile_n=1024,
                         small_block_bytes=4 * 1024 * 1024):
    """Computes x * a + b with a Pallas TPU kernel.

    x: array of any rank (flattened internally to (rows, lanes), last dim
       kept lane-dense).
    a, b: scalar module parameters (python numbers).
    """
    orig_shape = x.shape
    if x.ndim == 0:
        x2 = x.reshape(1, 1)
    elif x.ndim == 1:
        x2 = x.reshape(1, -1)
    else:
        x2 = x.reshape(-1, x.shape[-1])
    M, N = x2.shape

    kernel = _make_muladd_kernel(a, b)
    itemsize = jnp.dtype(x2.dtype).itemsize
    nbytes = M * N * itemsize
    cost = pl.CostEstimate(
        flops=2 * M * N,
        transcendentals=0,
        bytes_accessed=2 * nbytes,  # read x + write out
    )

    if nbytes <= small_block_bytes:
        # Whole array as a single VMEM block: no grid, no per-step overhead.
        out2 = pl.pallas_call(
            kernel,
            out_shape=jax.ShapeDtypeStruct((M, N), x2.dtype),
            cost_estimate=cost,
        )(x2)
        return out2.reshape(orig_shape)

    # Streaming path: big lane-dense 2-D blocks, double-buffered by Pallas.
    tile_m = _aligned_tile(M, max_tile_m, 8)
    tile_n = _aligned_tile(N, max_tile_n, 128)
    grid = (pl.cdiv(M, tile_m), pl.cdiv(N, tile_n))

    out2 = pl.pallas_call(
        kernel,
        out_shape=jax.ShapeDtypeStruct((M, N), x2.dtype),
        grid=grid,
        in_specs=[pl.BlockSpec((tile_m, tile_n), lambda i, j: (i, j))],
        out_specs=pl.BlockSpec((tile_m, tile_n), lambda i, j: (i, j)),
        compiler_params=pltpu.CompilerParams(
            dimension_semantics=("parallel", "parallel"),
            vmem_limit_bytes=32 * 1024 * 1024,
        ),
        cost_estimate=cost,
    )(x2)
    return out2.reshape(orig_shape)


if __name__ == "__main__":
    key = jax.random.PRNGKey(0)
    # Deterministic module parameters (TorchModule.__init__ takes a and b).
    a = 2.0
    b = -0.5

    # Small input consistent with the elementwise forward: single-block path.
    x_small = jax.random.normal(key, (16, 128), dtype=jnp.float32)
    y_small = torch_module_forward(x_small, a, b)
    jax.block_until_ready(y_small)
    ref_small = x_small * a + b
    assert jnp.allclose(y_small, ref_small, atol=1e-6, rtol=1e-6), \
        "small-shape mismatch vs reference"

    # Moderately sized input to exercise the tiled 2-D grid path.
    key2 = jax.random.PRNGKey(0)
    x_big = jax.random.normal(key2, (1024, 1280), dtype=jnp.float32)
    y_big = torch_module_forward(x_big, a, b)
    jax.block_until_ready(y_big)
    ref_big = x_big * a + b
    assert jnp.allclose(y_big, ref_big, atol=1e-6, rtol=1e-6), \
        "tiled-shape mismatch vs reference"

    print("KERNEL_OK")
</pallas_src>

<mosaic_0001>
module attributes {stable_mosaic.version = 11 : i64} {
  func.func @kernel(%arg0: memref<16x128xf32, #tpu.memory_space<vmem>>, %arg1: memref<16x128xf32, #tpu.memory_space<vmem>>) attributes {dimension_semantics = [], scalar_prefetch = 0 : i64, scratch_operands = 0 : i64, tpu.core_type = #tpu.core_type<tc>} {
    %c0 = arith.constant 0 : index
    %c0_0 = arith.constant 0 : index
    %0 = vector.load %arg0[%c0, %c0_0] : memref<16x128xf32, #tpu.memory_space<vmem>>, vector<16x128xf32>
    %cst = arith.constant 2.000000e+00 : f32
    %1 = vector.broadcast %cst : f32 to vector<16x128xf32>
    %2 = arith.mulf %0, %1 : vector<16x128xf32>
    %cst_1 = arith.constant -5.000000e-01 : f32
    %3 = vector.broadcast %cst_1 : f32 to vector<16x128xf32>
    %4 = arith.addf %2, %3 : vector<16x128xf32>
    %c0_2 = arith.constant 0 : index
    %c0_3 = arith.constant 0 : index
    %5 = vector.load %arg1[%c0_2, %c0_3] : memref<16x128xf32, #tpu.memory_space<vmem>>, vector<16x128xf32>
    tpu.vector_store %arg1[%c0_2, %c0_3], %4 {strides = array<i32>} : memref<16x128xf32, #tpu.memory_space<vmem>>, vector<16x128xf32>,
    return
  }
}

</mosaic_0001>

<bundles_post_ra>
// kernel: tpu_custom_call.1
= control target key start
LH: loop header
LB: loop body
LE: loop exit
PB: predicated region body
PF: predicated region fallthrough
CT: control target
= control target key end

     0   :  { %6 = vsyncpa [#allocation3], 0  ;;  %s144_s0 = inlined_call_operand.hbm [shape: f32[16,128], index: 0, kind: input, shape index: {}]   ;;  %s145_s1 = inlined_call_operand.hbm [shape: f32[16,128], index: 1, kind: output, shape index: {}]  }
   0x1   :  { %7 = vsyncpa [#allocation4], 0  ;;  %s100_s6 = smov [#allocation2]   ;;  %s52_s10 = scalar_lea.hbm %s144_s0, 256 }
   0x2   :  { %s13_s7 = sshll.u32 %s100_s6, 4  ;;  %p53_p0 = scmp.ne.s32.totalorder %s144_s0, %s52_s10  ;;  %s14_s7 = int_to_ptr.vmem [resolvable:$true] %s13_s7 }
   0x3   :  { %p56_p1 = scmp.lt.u32.totalorder %s52_s10, %s144_s0 }
   0x5   :  { %p58_p2 = pnand %p56_p1, %p53_p0 }
   0x7   :  { %61 = shalt.err (!%p58_p2)
}
   0x8   :  { %s62_s15 = scalar_lea.vmem %s14_s7, 256  ;;  %p67_p4 = scmp.lt.s32.totalorder %s14_s7, %s14_s7 }
   0x9   :  { %p63_p3 = scmp.ne.s32.totalorder %s14_s7, %s62_s15  ;;  %p68_p5 = scmp.lt.s32.totalorder %s62_s15, %s62_s15 }
   0xb   :  { %p69_p6 = por %p68_p5, %p67_p4 }
   0xd   :  { %p70_p7 = pnand %p69_p6, %p63_p3 }
   0xf   :  { %73 = shalt.err (!%p70_p7)
}
  0x10   :  { %s101_s16 = smov 128   ;;  %s102_s17 = smov 8  }
  0x11   :  { %19 = dma.hbm_to_vmem [thread:$0]  %s144_s0, 256, %s14_s7, [#allocation3], %s101_s16, %s101_s16, %s102_s17  }
  0x12   :  { %96 = dma.done.wait [#allocation3], 256  }
  0x13   :  { %97 = vsyncadd [#allocation3], 4294967040  ;;  %v23_v0 = vld [vmem:[#allocation2] sm:$0xff]  ;;  %v24_v1 = vld [vmem:[#allocation2 + $0x8] sm:$0xff]  ;;  %s103_s20 = smov [#allocation5]  }
  0x14   :  { %s36_s21 = sshll.u32 %s103_s20, 4  ;;  %v25_v2 = vmul.f32 2.0, %v23_v0  ;;  %v26_v3 = vmul.f32 2.0, %v24_v1  ;;  %s37_s21 = int_to_ptr.vmem [resolvable:$true] %s36_s21 }
  0x15   :  { %s74_s22 = scalar_lea.vmem %s37_s21, 256  ;;  %p79_p9 = scmp.lt.s32.totalorder %s37_s21, %s37_s21 }
  0x16   :  { %v27_v4 = vadd.f32 -0.5, %v25_v2  ;;  %v28_v5 = vadd.f32 -0.5, %v26_v3  ;;  %p75_p8 = scmp.ne.s32.totalorder %s37_s21, %s74_s22  ;;  %p80_p10 = scmp.lt.s32.totalorder %s74_s22, %s74_s22 }
  0x18   :  { %29 = vst [vmem:[#allocation5] sm:$0xff] %v27_v4  ;;  %30 = vst [vmem:[#allocation5 + $0x8] sm:$0xff] %v28_v5  ;;  %p81_p11 = por %p80_p10, %p79_p9 }
  0x1a   :  { %p82_p12 = pnand %p81_p11, %p75_p8 }
  0x1c   :  { %85 = shalt.err (!%p82_p12)
}
  0x1d   :  { %s86_s24 = scalar_lea.hbm %s145_s1, 256 }
  0x1e   :  { %p87_p13 = scmp.ne.s32.totalorder %s145_s1, %s86_s24  ;;  %p90_p0 = scmp.lt.u32.totalorder %s86_s24, %s145_s1 }
  0x20   :  { %p92_p1 = pnand %p90_p0, %p87_p13 }
  0x22   :  { %95 = shalt.err (!%p92_p1)
}
  0x23   :  { %42 = dma.vmem_to_hbm [thread:$0]  %s37_s21, 256, %s145_s1, [#allocation4], %s101_s16, %s101_s16, %s102_s17  }
  0x24   :  { %98 = dma.done.wait [#allocation4], 256  }
  0x25   :  { %99 = vsyncadd [#allocation4], 4294967040 }
  0x26   :  { %46 = vsyncpa [#allocation3], 1 }
  0x27   :  { %47 = vsyncpa [#allocation4], 1 }

</bundles_post_ra>
